<compile_context>
chip_gen: v7x
topology: tpu7x:2x2x1
jax: 0.10.0
libtpu: 0.0.40
codegen_flags: <defaults>
</compile_context>

<pallas_src>
import functools

import jax
import jax.numpy as jnp
from jax.experimental import pallas as pl
from jax.experimental.pallas import tpu as pltpu

_LANE_W = 512            # lane width of the flat slab (multiple of 128; MUST be even)
_MAX_BLOCK_ROWS = 2048   # block = 2048 x 512 f32 = 4 MiB; double-buffered in+out = 16 MiB
_TARGET_GRID = 4         # aim for >= 4 blocks so both v7x TensorCores get work
_PALLAS_MIN_ELEMS = 4096 # below this, plain jnp (XLA fusion) beats kernel dispatch cost

assert _LANE_W % 2 == 0, "q/p interleave requires an even lane width"
assert _LANE_W % 128 == 0, "lane width must be a multiple of the 128-lane vreg"


def _round_up(x, m):
    return ((x + m - 1) // m) * m


def _pendulum_kernel(x_ref, out_ref, *, m, g, l, r):
    # x_ref / out_ref: (block_rows, _LANE_W) f32 in VMEM.
    # Even lanes hold q, odd lanes hold p; the partner of lane 2k is lane 2k+1
    # of the same row.
    #
    # Invariant the correctness of the rolls depends on: _LANE_W is even and the
    # two rolls are exactly +-1 lane, so each roll's wrap-around value lands only
    # on lanes whose branch is discarded by the parity select below.
    x = x_ref[...]
    n_lanes = x.shape[-1]

    inv_ml2 = 1.0 / (m * l * l)
    mgl = m * g * l

    dp = x * inv_ml2          # at odd (p) lanes: dH/dp = p / (m l^2)   (reused twice)
    sin_q = jnp.sin(x)        # at even (q) lanes: sin(q)

    # Partner alignment via XLU lane rotations (free slot w.r.t. the VPU):
    #   roll(v, n-1)[i] == v[i+1]  -> at even (q) lanes: the partner dp
    #   roll(v, 1)[i]   == v[i-1]  -> at odd  (p) lanes: the partner sin(q)
    dp_at_q = pltpu.roll(dp, shift=n_lanes - 1, axis=1)
    sinq_at_p = pltpu.roll(sin_q, shift=1, axis=1)

    # Lane-parity mask from a single-sublane iota; jnp.where broadcasts it,
    # avoiding a full (block_rows, 512) iota + mod + compare on the VPU.
    lane = jax.lax.broadcasted_iota(jnp.int32, (1, n_lanes), 1)
    is_q_lane = (lane % 2) == 0

    out_at_p = (-mgl) * sinq_at_p - r * dp
    out_ref[...] = jnp.where(is_q_lane, dp_at_q, out_at_p)


def ode_pendulum_forward(t, x, *, mass, gravity, length, friction,
                         force_pallas=False):
    """Forward pass of ODEPendulum.  x: (N, 2) float32.  Returns (N, 2)."""
    del t  # unused, as in the PyTorch module
    x = jnp.asarray(x, jnp.float32)
    N = x.shape[0]
    total = 2 * N

    m, g, l, r = float(mass), float(gravity), float(length), float(friction)

    if total < _PALLAS_MIN_ELEMS and not force_pallas:
        # Tiny batch: Pallas dispatch/DMA setup would dominate; let XLA fuse it.
        q, p = x[:, 0], x[:, 1]
        dp = p * (1.0 / (m * l * l))
        return jnp.stack([dp, -(m * g * l) * jnp.sin(q) - r * dp], axis=1)

    # Free contiguous reshape to the interleaved flat layout.
    flat = x.reshape(-1)                       # [q0, p0, q1, p1, ...]
    rows = pl.cdiv(total, _LANE_W)
    pad = rows * _LANE_W - total
    if pad:
        # Ragged tail only: minimal pad (< 8 rows of zeros), NOT up to a
        # multiple of block_rows.  This is the only case with an extra HBM
        # pass (pad) + output slice; exact multiples go through zero-copy.
        rows = _round_up(rows, 8)
        pad = rows * _LANE_W - total
        flat = jnp.pad(flat, (0, pad))
    slab = flat.reshape(rows, _LANE_W)         # free, contiguous reshape

    # Block size: large enough to amortize the ~0.35us grid-step overhead,
    # small enough that the "parallel" grid axis has >= _TARGET_GRID steps
    # (feeds both v7x TensorCores).  Partial last block handled by Pallas.
    if rows <= 8:
        block_rows = rows                      # block dim == full array dim (legal)
    else:
        block_rows = max(8, min(_MAX_BLOCK_ROWS,
                                _round_up(pl.cdiv(rows, _TARGET_GRID), 8)))
    grid = pl.cdiv(rows, block_rows)

    kernel = functools.partial(_pendulum_kernel, m=m, g=g, l=l, r=r)

    out_slab = pl.pallas_call(
        kernel,
        out_shape=jax.ShapeDtypeStruct((rows, _LANE_W), jnp.float32),
        grid=(grid,),
        in_specs=[pl.BlockSpec((block_rows, _LANE_W), lambda i: (i, 0))],
        out_specs=pl.BlockSpec((block_rows, _LANE_W), lambda i: (i, 0)),
        compiler_params=pltpu.CompilerParams(
            dimension_semantics=("parallel",),       # shard across v7x's 2 TCs
            vmem_limit_bytes=32 * 1024 * 1024,       # safe on v5e/v6e/v7x
        ),
    )(slab)

    if pad:
        return out_slab.reshape(-1)[:total].reshape(N, 2)
    return out_slab.reshape(N, 2)


def _reference_forward(t, x, *, mass, gravity, length, friction):
    """Pure-JAX reference using autodiff, mirroring torch.autograd.grad."""
    del t
    m, g, l, r = mass, gravity, length, friction

    def hamiltonian_sum(coords):
        q, p = coords[:, 0], coords[:, 1]
        H = p**2 / (2.0 * m * l**2) + m * g * l * (1.0 - jnp.cos(q))
        return jnp.sum(H)

    dH = jax.grad(hamiltonian_sum)(x)                       # (N, 2)
    S = jnp.array([[0.0, 1.0], [-1.0, 0.0]], jnp.float32)
    field = dH @ S.T
    dH = dH.at[:, 0].set(0.0)
    field = field - r * dH
    return field


if __name__ == "__main__":
    mass, gravity, length, friction = 1.0, 9.81, 1.0, 0.1
    t = jnp.float32(0.0)

    run = functools.partial(ode_pendulum_forward, mass=mass, gravity=gravity,
                            length=length, friction=friction)
    ref = functools.partial(_reference_forward, mass=mass, gravity=gravity,
                            length=length, friction=friction)

    # 1) Tiny batch consistent with the module, forced through the Pallas path.
    N1 = 8
    x1 = jax.random.normal(jax.random.PRNGKey(0), (N1, 2), dtype=jnp.float32)
    out1 = jax.block_until_ready(run(t, x1, force_pallas=True))
    ref1 = ref(t, x1)
    assert out1.shape == (N1, 2) and out1.dtype == jnp.float32
    assert jnp.allclose(out1, ref1, atol=1e-5, rtol=1e-5), (out1, ref1)

    # 2) Exact-multiple batch: zero-copy path (no pad, no output slice).
    N2 = 4096                                   # total = 8192 = 16 rows of 512
    x2 = jax.random.normal(jax.random.PRNGKey(1), (N2, 2), dtype=jnp.float32)
    out2 = jax.block_until_ready(run(t, x2))
    assert jnp.allclose(out2, ref(t, x2), atol=1e-5, rtol=1e-5)

    # 3) Ragged batch: minimal-pad path with a partial last grid block.
    N3 = 3000                                   # total = 6000 -> 16 rows, grid = 2
    x3 = jax.random.normal(jax.random.PRNGKey(2), (N3, 2), dtype=jnp.float32)
    out3 = jax.block_until_ready(run(t, x3))
    assert jnp.allclose(out3, ref(t, x3), atol=1e-5, rtol=1e-5)

    print("KERNEL_OK")
</pallas_src>

<mosaic_0001>
module attributes {stable_mosaic.version = 11 : i64} {
  func.func @_pendulum_kernel(%arg0: i32, %arg1: memref<8x512xf32, #tpu.memory_space<vmem>>, %arg2: memref<8x512xf32, #tpu.memory_space<vmem>>) attributes {dimension_semantics = [#tpu.dimension_semantics<parallel>], iteration_bounds = array<i64: 1>, scalar_prefetch = 0 : i64, scratch_operands = 0 : i64, tpu.core_type = #tpu.core_type<tc>, window_params = [{transform_indices = @transform_0, window_bounds = array<i64: 8, 512>}, {transform_indices = @transform_1, window_bounds = array<i64: 8, 512>}]} {
    %c0 = arith.constant 0 : index
    %c0_0 = arith.constant 0 : index
    %0 = vector.load %arg1[%c0, %c0_0] : memref<8x512xf32, #tpu.memory_space<vmem>>, vector<8x512xf32>
    %cst = arith.constant 1.000000e+00 : f32
    %1 = vector.broadcast %cst : f32 to vector<8x512xf32>
    %2 = arith.mulf %0, %1 : vector<8x512xf32>
    %3 = math.sin %0 : vector<8x512xf32>
    %c511_i32 = arith.constant 511 : i32
    %4 = tpu.dynamic_rotate %2 by %c511_i32 dim 1 : vector<8x512xf32>, i32 -> vector<8x512xf32>
    %c1_i32 = arith.constant 1 : i32
    %5 = tpu.dynamic_rotate %3 by %c1_i32 dim 1 : vector<8x512xf32>, i32 -> vector<8x512xf32>
    %6 = tpu.iota {dimensions = array<i32: 1>} : vector<1x512xi32>
    %c2_i32 = arith.constant 2 : i32
    %c0_i32 = arith.constant 0 : i32
    %7 = arith.cmpi eq, %c2_i32, %c0_i32 : i32
    %c1_i32_1 = arith.constant 1 : i32
    %8 = arith.select %7, %c1_i32_1, %c2_i32 : i32
    %9 = vector.broadcast %8 : i32 to vector<1x512xi32>
    %10 = arith.remsi %6, %9 : vector<1x512xi32>
    %c0_i32_2 = arith.constant 0 : i32
    %11 = vector.broadcast %c0_i32_2 : i32 to vector<1x512xi32>
    %12 = arith.cmpi ne, %10, %11 : vector<1x512xi32>
    %c0_i32_3 = arith.constant 0 : i32
    %13 = vector.broadcast %c0_i32_3 : i32 to vector<1x512xi32>
    %14 = arith.cmpi slt, %10, %13 : vector<1x512xi32>
    %c0_i32_4 = arith.constant 0 : i32
    %15 = arith.cmpi slt, %8, %c0_i32_4 : i32
    %16 = vector.broadcast %15 : i1 to vector<1x512xi1>
    %17 = vector.broadcast %16 : vector<1x512xi1> to vector<1x512xi1>
    %18 = arith.xori %14, %17 : vector<1x512xi1>
    %19 = arith.andi %18, %12 : vector<1x512xi1>
    %20 = vector.broadcast %8 : i32 to vector<1x512xi32>
    %21 = arith.addi %10, %20 : vector<1x512xi32>
    %22 = arith.select %19, %21, %10 : vector<1x512xi1>, vector<1x512xi32>
    %c0_i32_5 = arith.constant 0 : i32
    %23 = vector.broadcast %c0_i32_5 : i32 to vector<1x512xi32>
    %24 = arith.cmpi eq, %22, %23 : vector<1x512xi32>
    %cst_6 = arith.constant -9.810000e+00 : f32
    %25 = vector.broadcast %cst_6 : f32 to vector<8x512xf32>
    %26 = arith.mulf %25, %5 : vector<8x512xf32>
    %cst_7 = arith.constant 1.000000e-01 : f32
    %27 = vector.broadcast %cst_7 : f32 to vector<8x512xf32>
    %28 = arith.mulf %27, %2 : vector<8x512xf32>
    %29 = arith.subf %26, %28 : vector<8x512xf32>
    %30 = vector.shape_cast %24 : vector<1x512xi1> to vector<1x512xi1>
    %31 = vector.broadcast %30 : vector<1x512xi1> to vector<8x512xi1>
    %32 = arith.select %31, %4, %29 : vector<8x512xi1>, vector<8x512xf32>
    %c0_8 = arith.constant 0 : index
    %c0_9 = arith.constant 0 : index
    %33 = vector.load %arg2[%c0_8, %c0_9] : memref<8x512xf32, #tpu.memory_space<vmem>>, vector<8x512xf32>
    tpu.vector_store %arg2[%c0_8, %c0_9], %32 {strides = array<i32>} : memref<8x512xf32, #tpu.memory_space<vmem>>, vector<8x512xf32>,
    return
  }
  func.func @transform_0(%arg0: i32) -> (i32, i32) {
    %c0_i32 = arith.constant 0 : i32
    %c0_i32_0 = arith.constant 0 : i32
    return %arg0, %c0_i32 : i32, i32
  }
  func.func @transform_1(%arg0: i32) -> (i32, i32) {
    %c0_i32 = arith.constant 0 : i32
    %c0_i32_0 = arith.constant 0 : i32
    return %arg0, %c0_i32 : i32, i32
  }
}

</mosaic_0001>

<bundles_post_ra>
// kernel: tpu_custom_call.1
= control target key start
LH: loop header
LB: loop body
LE: loop exit
PB: predicated region body
PF: predicated region fallthrough
CT: control target
= control target key end

     0   :  { %6 = vsyncpa [#allocation3], 0  ;;  %s1046_s0 = inlined_call_operand.hbm [shape: f32[8,512], index: 0, kind: input, shape index: {}]   ;;  %s1047_s1 = inlined_call_operand.hbm [shape: f32[8,512], index: 1, kind: output, shape index: {}]  }
   0x1   :  { %7 = vsyncpa [#allocation4], 0  ;;  %s673_s6 = smov [#allocation2]   ;;  %s625_s10 = scalar_lea.hbm %s1046_s0, 512 }
   0x2   :  { %s14_s7 = sshll.u32 %s673_s6, 4  ;;  %p626_p0 = scmp.ne.s32.totalorder %s1046_s0, %s625_s10  ;;  %s15_s7 = int_to_ptr.vmem [resolvable:$true] %s14_s7 }
   0x3   :  { %p629_p1 = scmp.lt.u32.totalorder %s625_s10, %s1046_s0 }
   0x5   :  { %p631_p2 = pnand %p629_p1, %p626_p0 }
   0x7   :  { %634 = shalt.err (!%p631_p2)
}
   0x8   :  { %s635_s15 = scalar_lea.vmem %s15_s7, 512  ;;  %p640_p4 = scmp.lt.s32.totalorder %s15_s7, %s15_s7 }
   0x9   :  { %p636_p3 = scmp.ne.s32.totalorder %s15_s7, %s635_s15  ;;  %p641_p5 = scmp.lt.s32.totalorder %s635_s15, %s635_s15 }
   0xb   :  { %p642_p6 = por %p641_p5, %p640_p4 }
   0xd   :  { %p643_p7 = pnand %p642_p6, %p636_p3 }
   0xf   :  { %646 = shalt.err (!%p643_p7)
}
  0x10   :  { %17 = dma.hbm_to_vmem [thread:$0]  %s1046_s0, 512, %s15_s7, [#allocation3]  }
  0x11   :  { %669 = dma.done.wait [#allocation3], 512  }
  0x12   :  { %670 = vsyncadd [#allocation3], 4294966784  ;;  %v705_v0 = vld [vmem:[#allocation2 + $0x8] sm:$0xff]  ;;  %v707_v1 = vld [vmem:[#allocation2] sm:$0xff]  ;;  %s674_s18 = smov 127   ;;  %s681_s0 = smov 1  }
  0x13   :  { %v709_v2 = vld [vmem:[#allocation2 + $0x10] sm:$0xff]  ;;  %443 = vrot.lane.b32.xlu1 %v705_v0, %s674_s18  ;;  %v132_v3 = vand.u32 2139095040, %v705_v0  ;;  %441 = vrot.lane.b32.xlu0 %v707_v1, %s674_s18  ;;  %v28_v4 = vand.u32 2139095040, %v707_v1  ;;  %v25_v7 = vand.u32 2147483647, %v707_v1  ;;  %v720_v10 = vld [vmem:[#allocation2 + $0x18] sm:$0xff] }
  0x14   :  { %v233_v5 = vand.u32 2147483647, %v709_v2  ;;  %v236_v6 = vand.u32 2139095040, %v709_v2  ;;  %v340_v16 = vand.u32 2139095040, %v720_v10  ;;  %v337_v27 = vand.u32 2147483647, %v720_v10 }
  0x15   :  { %v133_v8 = vshrl.u32 %v132_v3, 23  ;;  %v29_v9 = vshrl.u32 %v28_v4, 23  ;;  %v32_v13 = vand.u32 8388607, %v25_v7  ;;  %v675_v36 = vmov 683565275  }
  0x16   :  { %v237_v11 = vshrl.u32 %v236_v6, 23  ;;  %v240_v12 = vand.u32 8388607, %v233_v5  ;;  %v341_v22 = vshrl.u32 %v340_v16, 23  ;;  %v676_v38 = vmov 2475754826  }
  0x17   :  { %v567_v14 = vadd.s32 4294967169, %v29_v9  ;;  %v571_v17 = vadd.s32 4294967169, %v133_v8  ;;  %v33_v21 = vor.u32 8388608, %v32_v13  ;;  %v677_v40 = vmov 2131351028   ;;  %s682_s19 = smov [#allocation5]  }
  0x18   :  { %v575_v15 = vadd.s32 4294967169, %v237_v11  ;;  %v241_v19 = vor.u32 8388608, %v240_v12  ;;  %v579_v24 = vadd.s32 4294967169, %v341_v22  ;;  %v678_v42 = vmov 2102212464   ;;  %s558_s20 = sshll.u32 %s682_s19, 4  ;;  %s559_s20 = int_to_ptr.vmem [resolvable:$true] %s558_s20 }
  0x19   :  { %v35_v18 = vadd.s32 1, %v567_v14  ;;  %v727_v25 = vadd.s32 1, %v571_v17  ;;  %v734_v31 = vshll.u32 %v33_v21, 8  ;;  %v679_v49 = vmov 920167782   ;;  %s647_s21 = scalar_lea.vmem %s559_s20, 512  ;;  %p652_p9 = scmp.lt.s32.totalorder %s559_s20, %s559_s20 }
  0x1a   :  { %v243_v20 = vadd.s32 1, %v575_v15  ;;  %v732_v30 = vshll.u32 %v241_v19, 8  ;;  %v736_v35 = vadd.s32 1, %v579_v24  ;;  %v680_v57 = vmov 1326507024   ;;  %p648_p8 = scmp.ne.s32.totalorder %s559_s20, %s647_s21  ;;  %p653_p10 = scmp.lt.s32.totalorder %s647_s21, %s647_s21 }
  0x1b   :  { %vm36_vm0 = vcmp.gt.s32.totalorder %v35_v18, 0  ;;  %vm140_vm11 = vcmp.gt.s32.totalorder %v727_v25, 0  ;;  %vm235_vm14 = vcmp.lt.s32.totalorder %v709_v2, 0 }
  0x1c   :  { %v37_v23 = vsel %vm36_vm0, %v35_v18, 0  ;;  %vm244_vm1 = vcmp.gt.s32.totalorder %v243_v20, 0  ;;  %vm348_vm12 = vcmp.gt.s32.totalorder %v736_v35, 0  ;;  %p654_p11 = por %p653_p10, %p652_p9 }
  0x1d   :  { %v39_v26 = vand.u32 31, %v37_v23  ;;  %v730_v28 = vshrl.u32 %v37_v23, 5  ;;  %v245_v29 = vsel %vm244_vm1, %v243_v20, 0  ;;  %vm863_vm1 = vcmp.le.f32.partialorder %v233_v5, 0.7853982 }
  0x1e   :  { %v246_v32 = vshrl.u32 %v245_v29, 5  ;;  %v247_v33 = vand.u32 31, %v245_v29  ;;  %p655_p12 = pnand %p654_p11, %p648_p8 }
  0x1f   :  { %v40_v34 = vsub.s32 32, %v39_v26  ;;  %v42_v37 = vshll.u32 %v675_v36, %v39_v26  ;;  %v45_v39 = vshll.u32 %v676_v38, %v39_v26  ;;  %v48_v41 = vshll.u32 %v677_v40, %v39_v26 }
  0x20   :  { %v51_v43 = vshll.u32 %v678_v42, %v39_v26  ;;  %v248_v44 = vsub.s32 32, %v247_v33  ;;  %v250_v45 = vshll.u32 %v675_v36, %v247_v33  ;;  %v253_v46 = vshll.u32 %v676_v38, %v247_v33 }
  0x21   :  { %v256_v47 = vshll.u32 %v677_v40, %v247_v33  ;;  %v259_v48 = vshll.u32 %v678_v42, %v247_v33  ;;  %v262_v50 = vshll.u32 %v679_v49, %v247_v33  ;;  %vm265_vm2 = vcmp.lt.s32.totalorder %v246_v32, 1 }
  0x22   :  { %v54_v51 = vshll.u32 %v679_v49, %v39_v26  ;;  %v249_v52 = vshrl.u32 %v675_v36, %v248_v44  ;;  %v251_v53 = vshrl.u32 %v676_v38, %v248_v44  ;;  %v254_v54 = vshrl.u32 %v677_v40, %v248_v44 }
  0x23   :  { %v257_v55 = vshrl.u32 %v678_v42, %v248_v44  ;;  %v260_v56 = vshrl.u32 %v679_v49, %v248_v44  ;;  %v263_v58 = vshrl.u32 %v680_v57, %v248_v44  ;;  %vm266_vm3 = vcmp.lt.s32.totalorder %v246_v32, 2 }
  0x24   :  { %vm267_vm4 = vcmp.lt.s32.totalorder %v246_v32, 3  ;;  %v252_v59 = vor.u32 %v251_v53, %v250_v45  ;;  %v255_v60 = vor.u32 %v254_v54, %v253_v46  ;;  %vm268_vm5 = vcmp.lt.s32.totalorder %v246_v32, 4 }
  0x25   :  { %v258_v61 = vor.u32 %v257_v55, %v256_v47  ;;  %v261_v62 = vor.u32 %v260_v56, %v259_v48  ;;  %v264_v63 = vor.u32 %v263_v58, %v262_v50  ;;  %v43_v3 = vshrl.u32 %v676_v38, %v40_v34 }
  0x26   :  { %v46_v4 = vshrl.u32 %v677_v40, %v40_v34  ;;  %v269_v6 = vsel %vm265_vm2, %v249_v52, %v252_v59  ;;  %v273_v9 = vsel %vm265_vm2, %v252_v59, %v255_v60  ;;  %v41_v15 = vshrl.u32 %v675_v36, %v40_v34 }
  0x27   :  { %v270_v8 = vsel %vm268_vm5, %v258_v61, 2102212464  ;;  %v277_v11 = vsel %vm265_vm2, %v255_v60, %v258_v61  ;;  %v274_v13 = vsel %vm268_vm5, %v261_v62, 920167782  ;;  %v278_v14 = vsel %vm268_vm5, %v264_v63, 1326507024 }
  0x28   :  { %v271_v12 = vsel %vm267_vm4, %v255_v60, %v270_v8  ;;  %v275_v17 = vsel %vm267_vm4, %v258_v61, %v274_v13  ;;  %v279_v18 = vsel %vm267_vm4, %v261_v62, %v278_v14  ;;  %v44_v19 = vor.u32 %v43_v3, %v42_v37 }
  0x29   :  { %v272_v16 = vsel %vm266_vm3, %v269_v6, %v271_v12  ;;  %v276_v20 = vsel %vm266_vm3, %v273_v9, %v275_v17  ;;  %v280_v21 = vsel %vm266_vm3, %v277_v11, %v279_v18  ;;  %v47_v22 = vor.u32 %v46_v4, %v45_v39 }
  0x2a   :  { %v49_v23 = vshrl.u32 %v678_v42, %v40_v34  ;;  %v768_v24 = vmul.u32.u64.low %v732_v30, %v280_v21  ;;  %v769_v26 = vmul.u32.u64.high %v732_v30, %v280_v21, %v768_v24  ;;  %v52_v45 = vshrl.u32 %v679_v49, %v40_v34 }
  0x2b   :  { %v772_v29 = vmul.u32.u64.low %v732_v30, %v276_v20  ;;  %v773_v33 = vmul.u32.u64.high %v732_v30, %v276_v20, %v772_v29  ;;  %v55_v37 = vshrl.u32 %v680_v57, %v40_v34  ;;  %vm57_vm6 = vcmp.lt.s32.totalorder %v730_v28, 1 }
  0x2c   :  { %v50_v44 = vor.u32 %v49_v23, %v48_v41  ;;  %v288_v32 = vmul.u32 %v732_v30, %v272_v16  ;;  %vm58_vm7 = vcmp.lt.s32.totalorder %v730_v28, 2  ;;  %vm59_vm8 = vcmp.lt.s32.totalorder %v730_v28, 3 }
  0x2d   :  { %vm60_vm9 = vcmp.lt.s32.totalorder %v730_v28, 4  ;;  %v53_v39 = vor.u32 %v52_v45, %v51_v43  ;;  %v56_v46 = vor.u32 %v55_v37, %v54_v51  ;;  %v61_v47 = vsel %vm57_vm6, %v41_v15, %v44_v19 }
  0x2e   :  { %v62_v41 = vsel %vm60_vm9, %v50_v44, 2102212464  ;;  %vm290_vm10 = vc.u32 %v769_v26, %v772_v29  ;;  %v291_v34 = vadd.s32 1, %v773_v33  ;;  %v65_v48 = vsel %vm57_vm6, %v44_v19, %v47_v22 }
  0x2f   :  { %v63_v30 = vsel %vm59_vm8, %v47_v22, %v62_v41  ;;  %v66_v50 = vsel %vm60_vm9, %v53_v39, 920167782  ;;  %v69_v43 = vsel %vm57_vm6, %v47_v22, %v50_v44  ;;  %v70_v51 = vsel %vm60_vm9, %v56_v46, 1326507024 }
  0x30   :  { %v292_v52 = vsel %vm290_vm10, %v291_v34, %v773_v33  ;;  %v64_v53 = vsel %vm58_vm7, %v61_v47, %v63_v30  ;;  %v67_v54 = vsel %vm59_vm8, %v50_v44, %v66_v50  ;;  %v71_v55 = vsel %vm59_vm8, %v53_v39, %v70_v51 }
  0x31   :  { %v293_v56 = vadd.s32 %v292_v52, %v288_v32  ;;  %v68_v58 = vsel %vm58_vm7, %v65_v48, %v67_v54  ;;  %v72_v59 = vsel %vm58_vm7, %v69_v43, %v71_v55  ;;  %v349_v4 = vsel %vm348_vm12, %v736_v35, 0 }
  0x32   :  { %v808_v60 = vmul.u32.u64.low %v734_v31, %v72_v59  ;;  %v809_v61 = vmul.u32.u64.high %v734_v31, %v72_v59, %v808_v60  ;;  %v812_v62 = vmul.u32.u64.low %v734_v31, %v68_v58  ;;  %v813_v63 = vmul.u32.u64.high %v734_v31, %v68_v58, %v812_v62 }
  0x33   :  { %v294_v3 = vadd.s32 536870912, %v293_v56  ;;  %v351_v6 = vand.u32 31, %v349_v4  ;;  %v141_v28 = vsel %vm140_vm11, %v727_v25, 0  ;;  %v80_v9 = vmul.u32 %v734_v31, %v64_v53 }
  0x34   :  { %v344_v11 = vand.u32 8388607, %v337_v27  ;;  %vm82_vm13 = vc.u32 %v809_v61, %v812_v62  ;;  %v83_v12 = vadd.s32 1, %v813_v63  ;;  %v829_v14 = vand.u32 31, %v141_v28 }
  0x35   :  { %v820_v8 = vshrl.u32 %v294_v3, 30  ;;  %v352_v13 = vsub.s32 32, %v351_v6  ;;  %v129_v25 = vand.u32 2147483647, %v705_v0  ;;  %v354_v18 = vshll.u32 %v675_v36, %v351_v6 }
  0x36   :  { %v84_v15 = vsel %vm82_vm13, %v83_v12, %v813_v63  ;;  %v345_v17 = vor.u32 8388608, %v344_v11  ;;  %v357_v20 = vshll.u32 %v676_v38, %v351_v6  ;;  %v360_v22 = vshll.u32 %v677_v40, %v351_v6 }
  0x37   :  { %v296_v35 = vshll.u32 %v820_v8, 30  ;;  %v85_v31 = vadd.s32 %v84_v15, %v80_v9  ;;  %v355_v19 = vshrl.u32 %v676_v38, %v352_v13  ;;  %v358_v21 = vshrl.u32 %v677_v40, %v352_v13 }
  0x38   :  { %v361_v33 = vshrl.u32 %v678_v42, %v352_v13  ;;  %v363_v44 = vshll.u32 %v678_v42, %v351_v6  ;;  %v350_v45 = vshrl.u32 %v349_v4, 5  ;;  %v364_v37 = vshrl.u32 %v679_v49, %v352_v13 }
  0x39   :  { %v833_v16 = vsub.s32 %v293_v56, %v296_v35  ;;  %v86_v24 = vadd.s32 536870912, %v85_v31  ;;  %v366_v32 = vshll.u32 %v679_v49, %v351_v6  ;;  %v367_v39 = vshrl.u32 %v680_v57, %v352_v13 }
  0x3a   :  { %v846_v46 = vshrl.u32 %v141_v28, 5  ;;  %v289_v47 = vadd.s32 %v772_v29, %v769_v26  ;;  %v353_v30 = vshrl.u32 %v675_v36, %v352_v13  ;;  %v365_v48 = vor.u32 %v364_v37, %v363_v44 }
  0x3b   :  { %v299_v23 = vsub.s32 0, %v833_v16  ;;  %v852_v34 = vshrl.u32 %v86_v24, 30  ;;  %v855_v50 = vshll.u32 %v345_v17, 8  ;;  %v858_v43 = vsub.s32 32, %v829_v14 }
  0x3c   :  { %v356_v52 = vor.u32 %v355_v19, %v354_v18  ;;  %v359_v53 = vor.u32 %v358_v21, %v357_v20  ;;  %v362_v54 = vor.u32 %v361_v33, %v360_v22  ;;  %v368_v56 = vor.u32 %v367_v39, %v366_v32 }
  0x3d   :  { %v576_v41 = vmin.u32 %v299_v23, %v833_v16  ;;  %v88_v55 = vshll.u32 %v852_v34, 30  ;;  %vm369_vm15 = vcmp.lt.s32.totalorder %v350_v45, 1  ;;  %vm372_vm0 = vcmp.lt.s32.totalorder %v350_v45, 4 }
  0x3e   :  { %vm371_vm2 = vcmp.lt.s32.totalorder %v350_v45, 3  ;;  %v374_v58 = vsel %vm372_vm0, %v362_v54, 2102212464  ;;  %v378_v59 = vsel %vm372_vm0, %v365_v48, 920167782  ;;  %v319_v60 = vsub.s32 4, %v820_v8 }
  0x3f   :  { %v301_v51 = vclz %v576_v41  ;;  %v870_v63 = vsub.s32 %v85_v31, %v88_v55  ;;  %vm370_vm3 = vcmp.lt.s32.totalorder %v350_v45, 2  ;;  %v146_v3 = vshll.u32 %v675_v36, %v829_v14 }
  0x40   :  { %v373_v5 = vsel %vm369_vm15, %v353_v30, %v356_v52  ;;  %v375_v4 = vsel %vm371_vm2, %v359_v53, %v374_v58  ;;  %v377_v6 = vsel %vm369_vm15, %v356_v52, %v359_v53  ;;  %v379_v11 = vsel %vm371_vm2, %v362_v54, %v378_v59 }
  0x41   :  { %v577_v29 = vadd.s32 4294967294, %v301_v51  ;;  %v91_v9 = vsub.s32 0, %v870_v63  ;;  %v381_v12 = vsel %vm369_vm15, %v359_v53, %v362_v54  ;;  %v382_v31 = vsel %vm372_vm0, %v368_v56, 1326507024 }
  0x42   :  { %v320_v17 = vsel %vm235_vm14, %v319_v60, %v820_v8  ;;  %v383_v19 = vsel %vm371_vm2, %v365_v48, %v382_v31  ;;  %v149_v20 = vshll.u32 %v676_v38, %v829_v14  ;;  %v380_v23 = vsel %vm370_vm3, %v377_v6, %v379_v11 }
  0x43   :  { %vm578_vm4 = vcmp.lt.s32.totalorder %v577_v29, 0  ;;  %v568_v18 = vmin.u32 %v91_v9, %v870_v63  ;;  %v81_v24 = vadd.s32 %v812_v62, %v809_v61  ;;  %v376_v44 = vsel %vm370_vm3, %v373_v5, %v375_v4 }
  0x44   :  { %v304_v28 = vsel %vm578_vm4, 0, %v577_v29  ;;  %v152_v8 = vshll.u32 %v677_v40, %v829_v14  ;;  %v903_v48 = vmul.u32.u64.low %v855_v50, %v380_v23  ;;  %v904_v51 = vmul.u32.u64.high %v855_v50, %v380_v23, %v903_v48 }
  0x45   :  { %v305_v13 = vsub.s32 32, %v304_v28  ;;  %v306_v35 = vshll.u32 %v833_v16, %v304_v28  ;;  %v309_v15 = vsub.s32 4294967266, %v304_v28  ;;  %v384_v16 = vsel %vm370_vm3, %v381_v12, %v383_v19 }
  0x46   :  { %v93_v33 = vclz %v568_v18  ;;  %v897_v39 = vmul.u32.u64.low %v855_v50, %v384_v16  ;;  %v898_v41 = vmul.u32.u64.high %v855_v50, %v384_v16, %v897_v39  ;;  %v392_v45 = vmul.u32 %v855_v50, %v376_v44 }
  0x47   :  { %v307_v21 = vshrl.u32 %v289_v47, %v305_v13  ;;  %v310_v22 = vadd.s32 127, %v309_v15  ;;  %v322_v47 = vsel %vm863_vm1, 0, %v320_v17  ;;  %v147_v52 = vshrl.u32 %v676_v38, %v858_v43 }
  0x48   :  { %v569_v30 = vadd.s32 4294967294, %v93_v33  ;;  %v150_v53 = vshrl.u32 %v677_v40, %v858_v43  ;;  %v153_v54 = vshrl.u32 %v678_v42, %v858_v43  ;;  %v155_v55 = vshll.u32 %v678_v42, %v829_v14 }
  0x49   :  { %v308_v37 = vor.u32 %v307_v21, %v306_v35  ;;  %v311_v32 = vshll.u32 %v310_v22, 23  ;;  %vm394_vm6 = vc.u32 %v898_v41, %v903_v48  ;;  %v156_v50 = vshrl.u32 %v679_v49, %v858_v43 }
  0x4a   :  { %vm570_vm5 = vcmp.lt.s32.totalorder %v569_v30, 0  ;;  %v395_v40 = vadd.s32 1, %v904_v51  ;;  %v326_v5 = vadd.s32 3, %v322_v47  ;;  %v136_v4 = vand.u32 8388607, %v129_v25 }
  0x4b   :  { %v312_v61 = vor.u32 4788187, %v311_v32  ;;  %v315_v62 = vcvt.s32.f32 %v308_v37  ;;  %v96_v29 = vsel %vm570_vm5, 0, %v569_v30  ;;  %v148_v42 = vor.u32 %v147_v52, %v146_v3 }
  0x4c   :  { %v97_v58 = vsub.s32 32, %v96_v29  ;;  %v98_v38 = vshll.u32 %v870_v63, %v96_v29  ;;  %v101_v59 = vsub.s32 4294967266, %v96_v29  ;;  %v396_v9 = vsel %vm394_vm6, %v395_v40, %v904_v51 }
  0x4d   :  { %v313_v56 = vand.u32 2147483647, %v312_v61  ;;  %v151_v11 = vor.u32 %v150_v53, %v149_v20  ;;  %vm27_vm7 = vcmp.lt.s32.totalorder %v707_v1, 0  ;;  %v397_v13 = vadd.s32 %v396_v9, %v392_v45 }
  0x4e   :  { %v99_v6 = vshrl.u32 %v81_v24, %v97_v58  ;;  %v102_v28 = vadd.s32 127, %v101_v59  ;;  %v158_v63 = vshll.u32 %v679_v49, %v829_v14  ;;  %v159_v35 = vshrl.u32 %v680_v57, %v858_v43 }
  0x4f   :  { %v316_v60 = vmul.f32 %v315_v62, %v313_v56  ;;  %v154_v17 = vor.u32 %v153_v54, %v152_v8  ;;  %v157_v18 = vor.u32 %v156_v50, %v155_v55  ;;  %v398_v19 = vadd.s32 536870912, %v397_v13 }
  0x50   :  { %v100_v15 = vor.u32 %v99_v6, %v98_v38  ;;  %v103_v31 = vshll.u32 %v102_v28, 23  ;;  %v160_v21 = vor.u32 %v159_v35, %v158_v63  ;;  %vm161_vm8 = vcmp.lt.s32.totalorder %v846_v46, 1 }
  0x51   :  { %v317_v12 = vxor.u32 2147483648, %v316_v60  ;;  %vm164_vm9 = vcmp.lt.s32.totalorder %v846_v46, 4  ;;  %v111_v57 = vsub.s32 4, %v852_v34  ;;  %v938_v14 = vshrl.u32 %v398_v19, 30 }
  0x52   :  { %v104_v22 = vor.u32 4788187, %v103_v31  ;;  %v107_v49 = vcvt.s32.f32 %v100_v15  ;;  %vm163_vm10 = vcmp.lt.s32.totalorder %v846_v46, 3  ;;  %v137_v16 = vor.u32 8388608, %v136_v4 }
  0x53   :  { %v318_v3 = vsel %vm235_vm14, %v317_v12, %v316_v60  ;;  %v145_v24 = vshrl.u32 %v675_v36, %v858_v43  ;;  %v400_v26 = vshll.u32 %v938_v14, 30  ;;  %vm162_vm11 = vcmp.lt.s32.totalorder %v846_v46, 2 }
  0x54   :  { %v321_v20 = vsel %vm863_vm1, %v709_v2, %v318_v3  ;;  %v105_v23 = vand.u32 2147483647, %v104_v22  ;;  %v169_v33 = vsel %vm161_vm8, %v148_v42, %v151_v11  ;;  %v170_v44 = vsel %vm164_vm9, %v157_v18, 920167782 }
  0x55   :  { %609 = vcosq.f32 %v321_v20  ;;  %v171_v37 = vsel %vm163_vm10, %v154_v17, %v170_v44  ;;  %v173_v32 = vsel %vm161_vm8, %v151_v11, %v154_v17  ;;  %v174_v36 = vsel %vm164_vm9, %v160_v21, 1326507024 }
  0x56   :  { %611 = vsinq.f32 %v321_v20  ;;  %v108_v8 = vmul.f32 %v107_v49, %v105_v23  ;;  %vm957_vm12 = vcmp.le.f32.partialorder %v25_v7, 0.7853982  ;;  %v401_v39 = vsub.s32 %v397_v13, %v400_v26 }
  0x57   :  { %v166_v47 = vsel %vm164_vm9, %v154_v17, 2102212464  ;;  %v175_v30 = vsel %vm163_vm10, %v157_v18, %v174_v36  ;;  %v112_v61 = vsel %vm27_vm7, %v111_v57, %v852_v34  ;;  %v177_v45 = vshll.u32 %v137_v16, 8 }
  0x58   :  { %v109_v51 = vxor.u32 2147483648, %v108_v8  ;;  %v176_v62 = vsel %vm162_vm11, %v173_v32, %v175_v30  ;;  %v327_v7 = vand.u32 3, %v326_v5  ;;  %v403_v52 = vsub.s32 0, %v401_v39 }
  0x59   :  { %v165_v53 = vsel %vm161_vm8, %v145_v24, %v148_v42  ;;  %v172_v54 = vsel %vm162_vm11, %v169_v33, %v171_v37  ;;  %v167_v56 = vsel %vm163_vm10, %v151_v11, %v166_v47  ;;  %v114_v58 = vsel %vm957_vm12, 0, %v112_v61 }
  0x5a   :  { %v110_v55 = vsel %vm27_vm7, %v109_v51, %v108_v8  ;;  %v978_v29 = vmul.u32.u64.low %v177_v45, %v176_v62  ;;  %v979_v34 = vmul.u32.u64.high %v177_v45, %v176_v62, %v978_v29  ;;  %v580_v38 = vmin.u32 %v403_v52, %v401_v39 }
  0x5b   :  { %v113_v50 = vsel %vm957_vm12, %v707_v1, %v110_v55  ;;  %v986_v59 = vmul.u32.u64.low %v177_v45, %v172_v54  ;;  %v987_v40 = vmul.u32.u64.high %v177_v45, %v172_v54, %v986_v59  ;;  %vm332_vm13 = vcmp.eq.s32.totalorder %v327_v7, 2 }
  0x5c   :  { %613 = vcosq.f32 %v113_v50  ;;  %v405_v5 = vclz %v580_v38  ;;  %v168_v4 = vsel %vm162_vm11, %v165_v53, %v167_v56  ;;  %vm329_vm14 = vcmp.eq.s32.totalorder %v327_v7, 0 }
  0x5d   :  { %615 = vsinq.f32 %v113_v50  ;;  %v118_v28 = vadd.s32 3, %v114_v58  ;;  %vm328_vm15 = vcmp.lt.s32.totalorder %v327_v7, 2  ;;  %vm186_vm0 = vc.u32 %v979_v34, %v986_v59 }
  0x5e   :  { %v581_v11 = vadd.s32 4294967294, %v405_v5  ;;  %vm325_vm1 = vweird.f32 %v709_v2  ;;  %v184_v13 = vmul.u32 %v177_v45, %v168_v4  ;;  %v187_v63 = vadd.s32 1, %v987_v40 }
  0x5f   :  { %v610_v60 = vpop.eup %609  ;;  %v393_v46 = vadd.s32 %v903_v48, %v898_v41  ;;  %v119_v31 = vand.u32 3, %v118_v28  ;;  %vm117_vm6 = vweird.f32 %v707_v1  ;;  %v423_v30 = vsub.s32 4, %v938_v14 }
  0x60   :  { %v612_v42 = vpop.eup %611  ;;  %v333_v6 = vxor.u32 2147483648, %v610_v60  ;;  %vm582_vm2 = vcmp.lt.s32.totalorder %v581_v11, 0  ;;  %v188_v18 = vsel %vm186_vm0, %v187_v63, %v987_v40  ;;  %vm339_vm7 = vcmp.lt.s32.totalorder %v720_v10, 0 }
  0x61   :  { %v330_v9 = vxor.u32 2147483648, %v612_v42  ;;  %v408_v17 = vsel %vm582_vm2, 0, %v581_v11  ;;  %v189_v22 = vadd.s32 %v188_v18, %v184_v13  ;;  %vm124_vm3 = vcmp.eq.s32.totalorder %v119_v31, 2 }
  0x62   :  { %v334_v12 = vsel %vm332_vm13, %v333_v6, %v612_v42  ;;  %v409_v19 = vsub.s32 32, %v408_v17  ;;  %v410_v21 = vshll.u32 %v401_v39, %v408_v17  ;;  %v413_v20 = vsub.s32 4294967266, %v408_v17 }
  0x63   :  { %v331_v35 = vsel %vm329_vm14, %v610_v60, %v330_v9  ;;  %v190_v16 = vadd.s32 536870912, %v189_v22  ;;  %vm121_vm4 = vcmp.eq.s32.totalorder %v119_v31, 0  ;;  %vm120_vm5 = vcmp.lt.s32.totalorder %v119_v31, 2 }
  0x64   :  { %v335_v15 = vsel %vm328_vm15, %v331_v35, %v334_v12  ;;  %v411_v49 = vshrl.u32 %v393_v46, %v409_v19  ;;  %v414_v57 = vadd.s32 127, %v413_v20  ;;  %vm338_vm8 = vcmp.le.f32.partialorder %v337_v27, 0.7853982 }
  0x65   :  { %v336_v3 = vsel %vm325_vm1, nan, %v335_v15  ;;  %v191_v44 = vshrl.u32 %v190_v16, 30  ;;  %v424_v52 = vsel %vm339_vm7, %v423_v30, %v938_v14  ;;  %v185_v38 = vadd.s32 %v986_v59, %v979_v34 }
  0x66   :  { %460 = vrot.lane.b32.xlu1 %v336_v3, %s681_s0  ;;  %v614_v23 = vpop.eup %613  ;;  %v412_v24 = vor.u32 %v411_v49, %v410_v21  ;;  %v415_v26 = vshll.u32 %v414_v57, 23  ;;  %v426_v56 = vsel %vm338_vm8, 0, %v424_v52  ;;  %vm429_vm13 = vweird.f32 %v720_v10 }
  0x67   :  { %v616_v41 = vpop.eup %615  ;;  %v125_v48 = vxor.u32 2147483648, %v614_v23  ;;  %v192_v43 = vshll.u32 %v191_v44, 30  ;;  %v430_v58 = vadd.s32 3, %v426_v56  ;;  %v215_v46 = vsub.s32 4, %v191_v44 }
  0x68   :  { %v122_v33 = vxor.u32 2147483648, %v616_v41  ;;  %v416_v37 = vor.u32 4788187, %v415_v26  ;;  %v419_v32 = vcvt.s32.f32 %v412_v24  ;;  %vm131_vm14 = vcmp.lt.s32.totalorder %v705_v0, 0 }
  0x69   :  { %v126_v8 = vsel %vm124_vm3, %v125_v48, %v616_v41  ;;  %v193_v61 = vsub.s32 %v189_v22, %v192_v43  ;;  %v431_v4 = vand.u32 3, %v430_v58  ;;  %vm130_vm15 = vcmp.le.f32.partialorder %v129_v25, 0.7853982 }
  0x6a   :  { %v123_v36 = vsel %vm121_vm4, %v614_v23, %v122_v33  ;;  %v417_v47 = vand.u32 2147483647, %v416_v37  ;;  %v216_v19 = vsel %vm131_vm14, %v215_v46, %v191_v44  ;;  %vm221_vm3 = vweird.f32 %v705_v0 }
  0x6b   :  { %v127_v39 = vsel %vm120_vm5, %v123_v36, %v126_v8  ;;  %v195_v45 = vsub.s32 0, %v193_v61  ;;  %vm436_vm10 = vcmp.eq.s32.totalorder %v431_v4, 2  ;;  %vm433_vm11 = vcmp.eq.s32.totalorder %v431_v4, 0 }
  0x6c   :  { %v128_v51 = vsel %vm117_vm6, nan, %v127_v39  ;;  %v420_v62 = vmul.f32 %v419_v32, %v417_v47  ;;  %vm432_vm12 = vcmp.lt.s32.totalorder %v431_v4, 2  ;;  %v218_v22 = vsel %vm130_vm15, 0, %v216_v19 }
  0x6d   :  { %456 = vrot.lane.b32.xlu0 %v128_v51, %s681_s0  ;;  %v572_v53 = vmin.u32 %v195_v45, %v193_v61  ;;  %v222_v49 = vadd.s32 3, %v218_v22  ;;  %v449_v8 = vlaneseq  ;;  %v531_v51 = vmul.f32 0.1, %v720_v10 }
  0x6e   :  { %v421_v7 = vxor.u32 2147483648, %v420_v62 }
  0x6f   :  { %v197_v29 = vclz %v572_v53  ;;  %v223_v57 = vand.u32 3, %v222_v49  ;;  %v450_v37 = vand.u32 127, %v449_v8 }
  0x70   :  { %v422_v54 = vsel %vm339_vm7, %v421_v7, %v420_v62  ;;  %v528_v62 = vmul.f32 0.1, %v707_v1 }
  0x71   :  { %v425_v55 = vsel %vm338_vm8, %v720_v10, %v422_v54  ;;  %v573_v50 = vadd.s32 4294967294, %v197_v29  ;;  %vm228_vm0 = vcmp.eq.s32.totalorder %v223_v57, 2  ;;  %vm225_vm1 = vcmp.eq.s32.totalorder %v223_v57, 0 }
  0x72   :  { %617 = vcosq.f32 %v425_v55  ;;  %vm224_vm2 = vcmp.lt.s32.totalorder %v223_v57, 2  ;;  %v471_v43 = vadd.s32 384, %v450_v37  ;;  %vm464_vm4 = vcmp.lt.s32.totalorder %v450_v37, 1 }
  0x73   :  { %619 = vsinq.f32 %v425_v55  ;;  %vm574_vm9 = vcmp.lt.s32.totalorder %v573_v50, 0  ;;  %v476_v39 = vand.u32 1, %v450_v37  ;;  %vm451_vm5 = vcmp.lt.s32.totalorder %v450_v37, 127 }
  0x74   :  { %v200_v40 = vsel %vm574_vm9, 0, %v573_v50  ;;  %v497_v47 = vand.u32 1, %v471_v43  ;;  %v469_v1 = vadd.s32 128, %v450_v37 }
  0x75   :  { %v201_v60 = vsub.s32 32, %v200_v40  ;;  %v202_v27 = vshll.u32 %v193_v61, %v200_v40  ;;  %v205_v5 = vsub.s32 4294967266, %v200_v40  ;;  %vm520_vm6 = vcmp.eq.s32.totalorder %v476_v39, 0 }
  0x76   :  { %vm523_vm7 = vcmp.eq.s32.totalorder %v497_v47, 0  ;;  %v483_v40 = vand.u32 1, %v469_v1 }
  0x77   :  { %v203_v14 = vshrl.u32 %v185_v38, %v201_v60  ;;  %v206_v42 = vadd.s32 127, %v205_v5  ;;  %v470_v38 = vadd.s32 256, %v450_v37  ;;  %v530_v5 = vmul.f32 0.1, %v709_v2 }
  0x78   :  { %vm521_vm8 = vcmp.eq.s32.totalorder %v483_v40, 0 }
  0x79   :  { %v204_v6 = vor.u32 %v203_v14, %v202_v27  ;;  %v207_v28 = vshll.u32 %v206_v42, 23  ;;  %v490_v60 = vand.u32 1, %v470_v38  ;;  %v529_v27 = vmul.f32 0.1, %v705_v0 }
  0x7b   :  { %v208_v13 = vor.u32 4788187, %v207_v28  ;;  %v211_v63 = vcvt.s32.f32 %v204_v6  ;;  %vm522_vm9 = vcmp.eq.s32.totalorder %v490_v60, 0 }
  0x7c   :  { %v618_v9 = vpop.eup %617 }
  0x7d   :  { %v620_v11 = vpop.eup %619  ;;  %v437_v12 = vxor.u32 2147483648, %v618_v9  ;;  %v209_v59 = vand.u32 2147483647, %v208_v13 }
  0x7e   :  { %v434_v35 = vxor.u32 2147483648, %v620_v11 }
  0x7f   :  { %v438_v34 = vsel %vm436_vm10, %v437_v12, %v620_v11  ;;  %v212_v17 = vmul.f32 %v211_v63, %v209_v59 }
  0x80   :  { %v435_v15 = vsel %vm433_vm11, %v618_v9, %v434_v35 }
  0x81   :  { %v439_v31 = vsel %vm432_vm12, %v435_v15, %v438_v34  ;;  %v213_v3 = vxor.u32 2147483648, %v212_v17 }
  0x82   :  { %v440_v18 = vsel %vm429_vm13, nan, %v439_v31 }
  0x83   :  { %462 = vrot.lane.b32.xlu1 %v440_v18, %s681_s0  ;;  %v214_v21 = vsel %vm131_vm14, %v213_v3, %v212_v17 }
  0x84   :  { %v217_v20 = vsel %vm130_vm15, %v705_v0, %v214_v21 }
  0x85   :  { %621 = vcosq.f32 %v217_v20  ;;  %v444_v44 = vpop.permute.xlu1 %443  ;;  %v442_v32 = vpop.permute.xlu0 %441 }
  0x86   :  { %623 = vsinq.f32 %v217_v20  ;;  %v454_v29 = vsel %vm451_vm5, %v442_v32, %v444_v44 }
  0x87   :  { %447 = vrot.lane.b32.xlu1 %v720_v10, %s674_s18 }
  0x8f   :  { %v622_v23 = vpop.eup %621 }
  0x90   :  { %v624_v16 = vpop.eup %623  ;;  %v229_v41 = vxor.u32 2147483648, %v622_v23 }
  0x91   :  { %v226_v25 = vxor.u32 2147483648, %v624_v16 }
  0x92   :  { %v230_v48 = vsel %vm228_vm0, %v229_v41, %v624_v16 }
  0x93   :  { %v227_v24 = vsel %vm225_vm1, %v622_v23, %v226_v25 }
  0x94   :  { %v231_v26 = vsel %vm224_vm2, %v227_v24, %v230_v48 }
  0x95   :  { %v232_v33 = vsel %vm221_vm3, nan, %v231_v26 }
  0x96   :  { %458 = vrot.lane.b32.xlu0 %v232_v33, %s681_s0 }
  0x9a   :  { %445 = vrot.lane.b32.xlu0 %v709_v2, %s674_s18 }
  0xd8   :  { %v461_v36 = vpop.permute.xlu1 %460 }
  0xdf   :  { %v457_v30 = vpop.permute.xlu0 %456 }
  0xf5   :  { %v463_v61 = vpop.permute.xlu1 %462 }
  0xf6   :  { %v465_v45 = vsel %vm464_vm4, %v461_v36, %v463_v61  ;;  %v468_v7 = vsel %vm464_vm4, %v463_v61, %v457_v30 }
  0xf7   :  { %v524_v52 = vmul.f32 -9.81, %v468_v7  ;;  %v527_v53 = vmul.f32 -9.81, %v465_v45 }
  0xf9   :  { %v532_v54 = vsub.f32 %v524_v52, %v528_v62  ;;  %v535_v55 = vsub.f32 %v527_v53, %v531_v51  ;;  %v448_v56 = vpop.permute.xlu1 %447 }
  0xfa   :  { %v455_v50 = vsel %vm451_vm5, %v448_v56, %v442_v32 }
  0xfb   :  { %v544_v10 = vsel %vm520_vm6, %v454_v29, %v532_v54  ;;  %v547_v58 = vsel %vm523_vm7, %v455_v50, %v535_v55 }
  0xfc   :  { %548 = vst [vmem:[#allocation5] sm:$0xff] %v544_v10  ;;  %551 = vst [vmem:[#allocation5 + $0x18] sm:$0xff] %v547_v58 }
 0x108   :  { %v459_v4 = vpop.permute.xlu0 %458 }
 0x109   :  { %v466_v14 = vsel %vm464_vm4, %v459_v4, %v461_v36  ;;  %v467_v42 = vsel %vm464_vm4, %v457_v30, %v459_v4 }
 0x10a   :  { %v525_v6 = vmul.f32 -9.81, %v467_v42  ;;  %v526_v28 = vmul.f32 -9.81, %v466_v14 }
 0x10c   :  { %v533_v9 = vsub.f32 %v525_v6, %v529_v27  ;;  %v534_v11 = vsub.f32 %v526_v28, %v530_v5  ;;  %v446_v12 = vpop.permute.xlu0 %445 }
 0x10d   :  { %v452_v13 = vsel %vm451_vm5, %v446_v12, %v448_v56  ;;  %v453_v0 = vsel %vm451_vm5, %v444_v44, %v446_v12 }
 0x10e   :  { %v545_v2 = vsel %vm521_vm8, %v453_v0, %v533_v9  ;;  %v546_v63 = vsel %vm522_vm9, %v452_v13, %v534_v11 }
 0x10f   :  { %549 = vst [vmem:[#allocation5 + $0x8] sm:$0xff] %v545_v2  ;;  %550 = vst [vmem:[#allocation5 + $0x10] sm:$0xff] %v546_v63 }
 0x110   :  { %658 = shalt.err (!%p655_p12)
}
 0x111   :  { %s659_s24 = scalar_lea.hbm %s1047_s1, 512 }
 0x112   :  { %p660_p13 = scmp.ne.s32.totalorder %s1047_s1, %s659_s24  ;;  %p663_p0 = scmp.lt.u32.totalorder %s659_s24, %s1047_s1 }
 0x114   :  { %p665_p1 = pnand %p663_p0, %p660_p13 }
 0x116   :  { %668 = shalt.err (!%p665_p1)
}
 0x117   :  { %561 = dma.vmem_to_hbm [thread:$0]  %s559_s20, 512, %s1047_s1, [#allocation4]  }
 0x118   :  { %671 = dma.done.wait [#allocation4], 512  }
 0x119   :  { %672 = vsyncadd [#allocation4], 4294966784 }
 0x11a   :  { %565 = vsyncpa [#allocation3], 1 }
 0x11b   :  { %566 = vsyncpa [#allocation4], 1 }

</bundles_post_ra>
